<compile_context>
chip_gen: v7x
topology: tpu7x:2x2x1
jax: 0.10.0
libtpu: 0.0.40
codegen_flags: <defaults>
</compile_context>

<pallas_src>
import functools
import math

import jax
import jax.numpy as jnp
from jax.experimental import pallas as pl
from jax.experimental.pallas import tpu as pltpu

LANE = 128        # vreg lane width
SUBLANE = 8       # f32 sublane multiple
MAX_TILE_B = 1024 # batch-tile cap (VMEM-safe on v5e/v6e/v7x at these widths)


def _round_up(n, m):
    return ((n + m - 1) // m) * m


# ------------------------------- fused kernel --------------------------------

def _picnn_kernel(x_ref, y_ref, wa_ref, ba_ref, wb_ref, bb_ref, o_ref,
                  *, num_u_layers, zw):
    """Whole PICNN forward for one batch tile; everything lives in VMEM.

    Per z-layer, exactly two MXU matmuls:
      fu   = u @ [Wzu^T | Wyu^T | Wupath^T] + [bz | by | bu_path]     (K = UW)
      znew = [z*relu(fu_z) | y*fu_y | u] @ [Wz^T ; Wy^T ; Wu^T] + bu  (K = 2*ZW+UW)
    Padded lanes are provably zero through every layer (weights/biases zero-padded,
    min/max/relu preserve 0), so padding is mathematically inert.
    """
    L = num_u_layers
    u = x_ref[...]                       # (TB, UW)
    y = y_ref[...]                       # (TB, ZW)
    z = y

    for i in range(L + 1):               # static Python loop (L is compile-time)
        fu = jnp.dot(u, wa_ref[i], preferred_element_type=jnp.float32) + ba_ref[i]
        gate = jnp.maximum(fu[:, :zw], 0.0)            # relu(Wzu u + bz)
        yterm = y * fu[:, zw:2 * zw]                   # y * (Wyu u + by)
        lhs = jnp.concatenate([z * gate, yterm, u], axis=1)   # (TB, 2*ZW+UW)
        znew = (jnp.dot(lhs, wb_ref[i], preferred_element_type=jnp.float32)
                + bb_ref[i])                           # (TB, ZW)
        if i < L:
            z = jnp.minimum(znew, 0.0)                 # act = min(0, .)
            u = jnp.minimum(fu[:, 2 * zw:], 0.0)       # u-path layer + act
        else:
            z = znew                                   # final layer: no activation

    o_ref[...] = z.astype(o_ref.dtype)


# -------------------------------- parameters ---------------------------------

def init_params(u_layers, z_layers, key):
    """PyTorch-layout params mirroring PartialInputConcaveNN.__init__ distributions."""
    assert len(z_layers) == len(u_layers) + 1, "there must be 1 more z layer than u layer"
    ydim = z_layers[0]

    def unif(k, shape, fan):
        bound = math.sqrt(1.0 / fan)
        return jax.random.uniform(k, shape, jnp.float32, -bound, bound)

    u_params = []
    for odim, idim in zip(u_layers[1:], u_layers[:-1]):
        key, k1, k2 = jax.random.split(key, 3)
        W = jax.random.normal(k1, (odim, idim), jnp.float32)   # normal(0, 1)
        b = jax.random.normal(k2, (odim,), jnp.float32)
        u_params.append((W, b))

    z_params = []
    for i, (odim, idim) in enumerate(zip(z_layers[1:], z_layers[:-1])):
        udim = u_layers[i]
        key, *ks = jax.random.split(key, 9)
        Wz  = unif(ks[0], (odim, idim), idim)
        Wzu = unif(ks[1], (idim, udim), udim)
        bz  = unif(ks[2], (idim,), idim)
        Wy  = unif(ks[3], (odim, ydim), ydim)
        Wyu = unif(ks[4], (ydim, udim), udim)
        by  = unif(ks[5], (ydim,), ydim)
        Wu  = unif(ks[6], (odim, udim), udim)
        bu  = unif(ks[7], (odim,), odim)
        z_params.append((Wz, Wzu, bz, Wy, Wyu, by, Wu, bu))
    return u_params, z_params


def prepare_params(params, u_layers, z_layers):
    """One-time prep: build 4 stacked, fused, lane-padded parameter arrays.

    wa: (L+1, UW, 2*ZW+UW)  u-side fused RHS  [Wzu^T | Wyu^T | Wupath^T]
    ba: (L+1, 1,  2*ZW+UW)  u-side fused bias [bz    | by    | b_upath ]
    wb: (L+1, 2*ZW+UW, ZW)  out-side fused RHS [Wz^T ; Wy^T ; Wu^T]
    bb: (L+1, 1,  ZW)       out-side bias      bu
    """
    u_params, z_params = params
    L = len(u_params)
    ydim = z_layers[0]
    UW = max(_round_up(d, LANE) for d in u_layers)
    ZW = max(_round_up(d, LANE) for d in z_layers)
    WIN = 2 * ZW + UW

    wa = jnp.zeros((L + 1, UW, WIN), jnp.float32)
    ba = jnp.zeros((L + 1, 1, WIN), jnp.float32)
    wb = jnp.zeros((L + 1, WIN, ZW), jnp.float32)
    bb = jnp.zeros((L + 1, 1, ZW), jnp.float32)

    for i in range(L + 1):
        Wz, Wzu, bz, Wy, Wyu, by, Wu, bu = z_params[i]
        udim = u_layers[i]
        idim = z_layers[i]
        odim = z_layers[i + 1]
        # u-side fused RHS / bias
        wa = wa.at[i, :udim, :idim].set(Wzu.T)
        ba = ba.at[i, 0, :idim].set(bz)
        wa = wa.at[i, :udim, ZW:ZW + ydim].set(Wyu.T)
        ba = ba.at[i, 0, ZW:ZW + ydim].set(by)
        if i < L:
            W, b = u_params[i]
            unext = W.shape[0]
            wa = wa.at[i, :udim, 2 * ZW:2 * ZW + unext].set(W.T)
            ba = ba.at[i, 0, 2 * ZW:2 * ZW + unext].set(b)
        # out-side fused RHS / bias
        wb = wb.at[i, :idim, :odim].set(Wz.T)
        wb = wb.at[i, ZW:ZW + ydim, :odim].set(Wy.T)
        wb = wb.at[i, 2 * ZW:2 * ZW + udim, :odim].set(Wu.T)
        bb = bb.at[i, 0, :odim].set(bu)

    meta = dict(num_u_layers=L, u_layers=tuple(u_layers), z_layers=tuple(z_layers),
                UW=UW, ZW=ZW, WIN=WIN,
                xdim=u_layers[0], ydim=ydim, zout=z_layers[-1])
    return (wa, ba, wb, bb), meta


# ---------------------------------- wrapper -----------------------------------

def picnn_forward(x, y, fused, meta):
    wa, ba, wb, bb = fused
    B = x.shape[0]
    L = meta["num_u_layers"]
    UW, ZW, WIN = meta["UW"], meta["ZW"], meta["WIN"]
    xdim, ydim, zout = meta["xdim"], meta["ydim"], meta["zout"]

    # Batch tile: sublane-aligned; >= 2 grid steps for B > 8 so the "parallel"
    # axis shards across both v7x TensorCores (no-op on v5e/v6e); capped at 1024.
    if B <= SUBLANE:
        tile_b = SUBLANE
    else:
        tile_b = min(MAX_TILE_B, _round_up(-(-B // 2), SUBLANE))
    Bp = _round_up(B, tile_b)
    grid = (Bp // tile_b,)

    # single pad per input (batch pad + lane pad folded into one copy)
    x_p = jnp.pad(x.astype(jnp.float32), ((0, Bp - B), (0, UW - xdim)))
    y_p = jnp.pad(y.astype(jnp.float32), ((0, Bp - B), (0, ZW - ydim)))

    in_specs = [
        pl.BlockSpec((tile_b, UW), lambda b: (b, 0)),
        pl.BlockSpec((tile_b, ZW), lambda b: (b, 0)),
        # fused parameters: whole-array blocks, VMEM-resident across batch tiles
        pl.BlockSpec(wa.shape, lambda b: (0, 0, 0)),
        pl.BlockSpec(ba.shape, lambda b: (0, 0, 0)),
        pl.BlockSpec(wb.shape, lambda b: (0, 0, 0)),
        pl.BlockSpec(bb.shape, lambda b: (0, 0, 0)),
    ]
    out_specs = pl.BlockSpec((tile_b, ZW), lambda b: (b, 0))

    # Real (unpadded) work for the scheduler hint.
    u_l, z_l = meta["u_layers"], meta["z_layers"]
    flops = 0
    param_elems = 0
    for i in range(L + 1):
        unext = u_l[i + 1] if i < L else 0
        flops += 2 * B * u_l[i] * (z_l[i] + ydim + unext)          # u-side fused
        flops += 2 * B * (z_l[i] + ydim + u_l[i]) * z_l[i + 1]     # out-side fused
        param_elems += u_l[i] * (z_l[i] + ydim + unext) + z_l[i] + ydim + unext
        param_elems += (z_l[i] + ydim + u_l[i]) * z_l[i + 1] + z_l[i + 1]
    bytes_accessed = 4 * (B * (xdim + ydim + zout) + param_elems)

    # Explicit VMEM budget: double-buffered params + I/O blocks + live temporaries,
    # with headroom; capped well below v7x's 64 MiB physical VMEM.
    param_bytes = 4 * sum(int(a.size) for a in (wa, ba, wb, bb))
    io_bytes = 4 * tile_b * (UW + 2 * ZW)
    act_bytes = 4 * tile_b * WIN
    vmem_est = 2 * param_bytes + 2 * io_bytes + 12 * act_bytes
    vmem_limit = int(min(max(vmem_est, 16 * 2**20), 48 * 2**20))

    out = pl.pallas_call(
        functools.partial(_picnn_kernel, num_u_layers=L, zw=ZW),
        out_shape=jax.ShapeDtypeStruct((Bp, ZW), jnp.float32),
        grid=grid,
        in_specs=in_specs,
        out_specs=out_specs,
        compiler_params=pltpu.CompilerParams(
            dimension_semantics=("parallel",),
            vmem_limit_bytes=vmem_limit),
        cost_estimate=pl.CostEstimate(
            flops=int(flops), transcendentals=0, bytes_accessed=int(bytes_accessed)),
    )(x_p, y_p, wa, ba, wb, bb)

    return out[:B, :zout]


# --------------------------------- reference ----------------------------------

def _reference(x, y, params):
    """Pure-JAX mirror of PartialInputConcaveNN.forward (PyTorch layout params)."""
    u_params, z_params = params
    u, z = x, y
    L = len(u_params)

    def z_layer(p, z, u):
        Wz, Wzu, bz, Wy, Wyu, by, Wu, bu = p
        zz = (z * jax.nn.relu(u @ Wzu.T + bz)) @ Wz.T
        zz = zz + (y * (u @ Wyu.T + by)) @ Wy.T
        zz = zz + u @ Wu.T + bu
        return zz

    for i in range(L):
        z = jnp.minimum(z_layer(z_params[i], z, u), 0.0)
        W, b = u_params[i]
        u = jnp.minimum(u @ W.T + b, 0.0)
    return z_layer(z_params[L], z, u)


# TODO(synk): clamp_weights() and loss() in the PyTorch module are training-time
# utilities, not part of forward(), so they are intentionally not kernelised.

if __name__ == "__main__":
    # Small shapes consistent with the module: u_layers=[xdim, ...], z_layers=[ydim, ..., out]
    u_layers = [16, 32, 32]       # xdim = 16, two u-path layers
    z_layers = [8, 32, 32, 8]     # ydim = 8, three z-path layers, output dim 8
    batch = 4

    key = jax.random.PRNGKey(0)
    key, kx, ky = jax.random.split(key, 3)
    x = jax.random.normal(kx, (batch, u_layers[0]), jnp.float32)
    y = jax.random.normal(ky, (batch, z_layers[0]), jnp.float32)

    params = init_params(u_layers, z_layers, key)
    fused, meta = prepare_params(params, u_layers, z_layers)

    fwd = jax.jit(lambda xx, yy: picnn_forward(xx, yy, fused, meta))
    out = jax.block_until_ready(fwd(x, y))

    ref = _reference(x, y, params)
    assert out.shape == (batch, z_layers[-1])
    assert jnp.allclose(out, ref, atol=1e-3, rtol=5e-4), "mismatch vs reference"

    print("KERNEL_OK")
</pallas_src>

<mosaic_0001>
module attributes {stable_mosaic.version = 11 : i64} {
  func.func @_picnn_kernel(%arg0: i32, %arg1: memref<8x128xf32, #tpu.memory_space<vmem>>, %arg2: memref<8x128xf32, #tpu.memory_space<vmem>>, %arg3: memref<3x128x384xf32, #tpu.memory_space<vmem>>, %arg4: memref<3x1x384xf32, #tpu.memory_space<vmem>>, %arg5: memref<3x384x128xf32, #tpu.memory_space<vmem>>, %arg6: memref<3x1x128xf32, #tpu.memory_space<vmem>>, %arg7: memref<8x128xf32, #tpu.memory_space<vmem>>) attributes {dimension_semantics = [#tpu.dimension_semantics<parallel>], iteration_bounds = array<i64: 1>, scalar_prefetch = 0 : i64, scratch_operands = 0 : i64, tpu.core_type = #tpu.core_type<tc>, window_params = [{transform_indices = @transform_0, window_bounds = array<i64: 8, 128>}, {transform_indices = @transform_1, window_bounds = array<i64: 8, 128>}, {pipeline_mode = #tpu.pipeline_mode<synchronous>, transform_indices = @transform_2, window_bounds = array<i64: 3, 128, 384>}, {pipeline_mode = #tpu.pipeline_mode<synchronous>, transform_indices = @transform_3, window_bounds = array<i64: 3, 1, 384>}, {pipeline_mode = #tpu.pipeline_mode<synchronous>, transform_indices = @transform_4, window_bounds = array<i64: 3, 384, 128>}, {pipeline_mode = #tpu.pipeline_mode<synchronous>, transform_indices = @transform_5, window_bounds = array<i64: 3, 1, 128>}, {transform_indices = @transform_6, window_bounds = array<i64: 8, 128>}]} {
    %c0 = arith.constant 0 : index
    %c0_0 = arith.constant 0 : index
    %0 = vector.load %arg1[%c0, %c0_0] : memref<8x128xf32, #tpu.memory_space<vmem>>, vector<8x128xf32>
    %c0_1 = arith.constant 0 : index
    %c0_2 = arith.constant 0 : index
    %1 = vector.load %arg2[%c0_1, %c0_2] : memref<8x128xf32, #tpu.memory_space<vmem>>, vector<8x128xf32>
    %c0_3 = arith.constant 0 : index
    %c0_4 = arith.constant 0 : index
    %c0_5 = arith.constant 0 : index
    %2 = vector.load %arg3[%c0_3, %c0_4, %c0_5] : memref<3x128x384xf32, #tpu.memory_space<vmem>>, vector<1x128x384xf32>
    %3 = vector.shape_cast %2 : vector<1x128x384xf32> to vector<128x384xf32>
    %cst = arith.constant dense<0.000000e+00> : vector<8x384xf32>
    %4 = tpu.matmul %0, %3, %cst {dimension_numbers = #tpu.dot_dimension_numbers<[1], [0], [0], [1], [0, 0, 1, 1], [], []>} : vector<8x128xf32>, vector<128x384xf32>, vector<8x384xf32> -> vector<8x384xf32>
    %c0_6 = arith.constant 0 : index
    %c0_7 = arith.constant 0 : index
    %c0_8 = arith.constant 0 : index
    %5 = vector.load %arg4[%c0_6, %c0_7, %c0_8] : memref<3x1x384xf32, #tpu.memory_space<vmem>>, vector<1x1x384xf32>
    %6 = vector.shape_cast %5 : vector<1x1x384xf32> to vector<1x384xf32>
    %7 = vector.broadcast %6 : vector<1x384xf32> to vector<8x384xf32>
    %8 = arith.addf %4, %7 : vector<8x384xf32>
    %9 = vector.extract_strided_slice %8 {offsets = [0, 0], sizes = [8, 128], strides = [1, 1]} : vector<8x384xf32> to vector<8x128xf32>
    %cst_9 = arith.constant 0.000000e+00 : f32
    %10 = vector.broadcast %cst_9 : f32 to vector<8x128xf32>
    %11 = arith.maximumf %9, %10 : vector<8x128xf32>
    %12 = vector.extract_strided_slice %8 {offsets = [0, 128], sizes = [8, 128], strides = [1, 1]} : vector<8x384xf32> to vector<8x128xf32>
    %13 = arith.mulf %1, %12 : vector<8x128xf32>
    %14 = arith.mulf %1, %11 : vector<8x128xf32>
    %15 = tpu.concatenate %14, %13, %0 in 1 : vector<8x128xf32>, vector<8x128xf32>, vector<8x128xf32> -> vector<8x384xf32>
    %c0_10 = arith.constant 0 : index
    %c0_11 = arith.constant 0 : index
    %c0_12 = arith.constant 0 : index
    %16 = vector.load %arg5[%c0_10, %c0_11, %c0_12] : memref<3x384x128xf32, #tpu.memory_space<vmem>>, vector<1x384x128xf32>
    %17 = vector.shape_cast %16 : vector<1x384x128xf32> to vector<384x128xf32>
    %cst_13 = arith.constant dense<0.000000e+00> : vector<8x128xf32>
    %18 = tpu.matmul %15, %17, %cst_13 {dimension_numbers = #tpu.dot_dimension_numbers<[1], [0], [0], [1], [0, 0, 1, 1], [], []>} : vector<8x384xf32>, vector<384x128xf32>, vector<8x128xf32> -> vector<8x128xf32>
    %c0_14 = arith.constant 0 : index
    %c0_15 = arith.constant 0 : index
    %c0_16 = arith.constant 0 : index
    %19 = vector.load %arg6[%c0_14, %c0_15, %c0_16] : memref<3x1x128xf32, #tpu.memory_space<vmem>>, vector<1x1x128xf32>
    %20 = vector.shape_cast %19 : vector<1x1x128xf32> to vector<1x128xf32>
    %21 = vector.broadcast %20 : vector<1x128xf32> to vector<8x128xf32>
    %22 = arith.addf %18, %21 : vector<8x128xf32>
    %cst_17 = arith.constant 0.000000e+00 : f32
    %23 = vector.broadcast %cst_17 : f32 to vector<8x128xf32>
    %24 = arith.minimumf %22, %23 : vector<8x128xf32>
    %25 = vector.extract_strided_slice %8 {offsets = [0, 256], sizes = [8, 128], strides = [1, 1]} : vector<8x384xf32> to vector<8x128xf32>
    %cst_18 = arith.constant 0.000000e+00 : f32
    %26 = vector.broadcast %cst_18 : f32 to vector<8x128xf32>
    %27 = arith.minimumf %25, %26 : vector<8x128xf32>
    %c1 = arith.constant 1 : index
    %c0_19 = arith.constant 0 : index
    %c0_20 = arith.constant 0 : index
    %28 = vector.load %arg3[%c1, %c0_19, %c0_20] : memref<3x128x384xf32, #tpu.memory_space<vmem>>, vector<1x128x384xf32>
    %29 = vector.shape_cast %28 : vector<1x128x384xf32> to vector<128x384xf32>
    %cst_21 = arith.constant dense<0.000000e+00> : vector<8x384xf32>
    %30 = tpu.matmul %27, %29, %cst_21 {dimension_numbers = #tpu.dot_dimension_numbers<[1], [0], [0], [1], [0, 0, 1, 1], [], []>} : vector<8x128xf32>, vector<128x384xf32>, vector<8x384xf32> -> vector<8x384xf32>
    %c1_22 = arith.constant 1 : index
    %c0_23 = arith.constant 0 : index
    %c0_24 = arith.constant 0 : index
    %31 = vector.load %arg4[%c1_22, %c0_23, %c0_24] : memref<3x1x384xf32, #tpu.memory_space<vmem>>, vector<1x1x384xf32>
    %32 = vector.shape_cast %31 : vector<1x1x384xf32> to vector<1x384xf32>
    %33 = vector.broadcast %32 : vector<1x384xf32> to vector<8x384xf32>
    %34 = arith.addf %30, %33 : vector<8x384xf32>
    %35 = vector.extract_strided_slice %34 {offsets = [0, 0], sizes = [8, 128], strides = [1, 1]} : vector<8x384xf32> to vector<8x128xf32>
    %cst_25 = arith.constant 0.000000e+00 : f32
    %36 = vector.broadcast %cst_25 : f32 to vector<8x128xf32>
    %37 = arith.maximumf %35, %36 : vector<8x128xf32>
    %38 = vector.extract_strided_slice %34 {offsets = [0, 128], sizes = [8, 128], strides = [1, 1]} : vector<8x384xf32> to vector<8x128xf32>
    %39 = arith.mulf %1, %38 : vector<8x128xf32>
    %40 = arith.mulf %24, %37 : vector<8x128xf32>
    %41 = tpu.concatenate %40, %39, %27 in 1 : vector<8x128xf32>, vector<8x128xf32>, vector<8x128xf32> -> vector<8x384xf32>
    %c1_26 = arith.constant 1 : index
    %c0_27 = arith.constant 0 : index
    %c0_28 = arith.constant 0 : index
    %42 = vector.load %arg5[%c1_26, %c0_27, %c0_28] : memref<3x384x128xf32, #tpu.memory_space<vmem>>, vector<1x384x128xf32>
    %43 = vector.shape_cast %42 : vector<1x384x128xf32> to vector<384x128xf32>
    %cst_29 = arith.constant dense<0.000000e+00> : vector<8x128xf32>
    %44 = tpu.matmul %41, %43, %cst_29 {dimension_numbers = #tpu.dot_dimension_numbers<[1], [0], [0], [1], [0, 0, 1, 1], [], []>} : vector<8x384xf32>, vector<384x128xf32>, vector<8x128xf32> -> vector<8x128xf32>
    %c1_30 = arith.constant 1 : index
    %c0_31 = arith.constant 0 : index
    %c0_32 = arith.constant 0 : index
    %45 = vector.load %arg6[%c1_30, %c0_31, %c0_32] : memref<3x1x128xf32, #tpu.memory_space<vmem>>, vector<1x1x128xf32>
    %46 = vector.shape_cast %45 : vector<1x1x128xf32> to vector<1x128xf32>
    %47 = vector.broadcast %46 : vector<1x128xf32> to vector<8x128xf32>
    %48 = arith.addf %44, %47 : vector<8x128xf32>
    %cst_33 = arith.constant 0.000000e+00 : f32
    %49 = vector.broadcast %cst_33 : f32 to vector<8x128xf32>
    %50 = arith.minimumf %48, %49 : vector<8x128xf32>
    %51 = vector.extract_strided_slice %34 {offsets = [0, 256], sizes = [8, 128], strides = [1, 1]} : vector<8x384xf32> to vector<8x128xf32>
    %cst_34 = arith.constant 0.000000e+00 : f32
    %52 = vector.broadcast %cst_34 : f32 to vector<8x128xf32>
    %53 = arith.minimumf %51, %52 : vector<8x128xf32>
    %c2 = arith.constant 2 : index
    %c0_35 = arith.constant 0 : index
    %c0_36 = arith.constant 0 : index
    %54 = vector.load %arg3[%c2, %c0_35, %c0_36] : memref<3x128x384xf32, #tpu.memory_space<vmem>>, vector<1x128x384xf32>
    %55 = vector.shape_cast %54 : vector<1x128x384xf32> to vector<128x384xf32>
    %cst_37 = arith.constant dense<0.000000e+00> : vector<8x384xf32>
    %56 = tpu.matmul %53, %55, %cst_37 {dimension_numbers = #tpu.dot_dimension_numbers<[1], [0], [0], [1], [0, 0, 1, 1], [], []>} : vector<8x128xf32>, vector<128x384xf32>, vector<8x384xf32> -> vector<8x384xf32>
    %c2_38 = arith.constant 2 : index
    %c0_39 = arith.constant 0 : index
    %c0_40 = arith.constant 0 : index
    %57 = vector.load %arg4[%c2_38, %c0_39, %c0_40] : memref<3x1x384xf32, #tpu.memory_space<vmem>>, vector<1x1x384xf32>
    %58 = vector.shape_cast %57 : vector<1x1x384xf32> to vector<1x384xf32>
    %59 = vector.broadcast %58 : vector<1x384xf32> to vector<8x384xf32>
    %60 = arith.addf %56, %59 : vector<8x384xf32>
    %61 = vector.extract_strided_slice %60 {offsets = [0, 0], sizes = [8, 128], strides = [1, 1]} : vector<8x384xf32> to vector<8x128xf32>
    %cst_41 = arith.constant 0.000000e+00 : f32
    %62 = vector.broadcast %cst_41 : f32 to vector<8x128xf32>
    %63 = arith.maximumf %61, %62 : vector<8x128xf32>
    %64 = vector.extract_strided_slice %60 {offsets = [0, 128], sizes = [8, 128], strides = [1, 1]} : vector<8x384xf32> to vector<8x128xf32>
    %65 = arith.mulf %1, %64 : vector<8x128xf32>
    %66 = arith.mulf %50, %63 : vector<8x128xf32>
    %67 = tpu.concatenate %66, %65, %53 in 1 : vector<8x128xf32>, vector<8x128xf32>, vector<8x128xf32> -> vector<8x384xf32>
    %c2_42 = arith.constant 2 : index
    %c0_43 = arith.constant 0 : index
    %c0_44 = arith.constant 0 : index
    %68 = vector.load %arg5[%c2_42, %c0_43, %c0_44] : memref<3x384x128xf32, #tpu.memory_space<vmem>>, vector<1x384x128xf32>
    %69 = vector.shape_cast %68 : vector<1x384x128xf32> to vector<384x128xf32>
    %cst_45 = arith.constant dense<0.000000e+00> : vector<8x128xf32>
    %70 = tpu.matmul %67, %69, %cst_45 {dimension_numbers = #tpu.dot_dimension_numbers<[1], [0], [0], [1], [0, 0, 1, 1], [], []>} : vector<8x384xf32>, vector<384x128xf32>, vector<8x128xf32> -> vector<8x128xf32>
    %c2_46 = arith.constant 2 : index
    %c0_47 = arith.constant 0 : index
    %c0_48 = arith.constant 0 : index
    %71 = vector.load %arg6[%c2_46, %c0_47, %c0_48] : memref<3x1x128xf32, #tpu.memory_space<vmem>>, vector<1x1x128xf32>
    %72 = vector.shape_cast %71 : vector<1x1x128xf32> to vector<1x128xf32>
    %73 = vector.broadcast %72 : vector<1x128xf32> to vector<8x128xf32>
    %74 = arith.addf %70, %73 : vector<8x128xf32>
    %c0_49 = arith.constant 0 : index
    %c0_50 = arith.constant 0 : index
    %75 = vector.load %arg7[%c0_49, %c0_50] : memref<8x128xf32, #tpu.memory_space<vmem>>, vector<8x128xf32>
    tpu.vector_store %arg7[%c0_49, %c0_50], %74 {strides = array<i32>} : memref<8x128xf32, #tpu.memory_space<vmem>>, vector<8x128xf32>,
    return
  }
  func.func @transform_0(%arg0: i32) -> (i32, i32) {
    %c0_i32 = arith.constant 0 : i32
    %c0_i32_0 = arith.constant 0 : i32
    return %arg0, %c0_i32 : i32, i32
  }
  func.func @transform_1(%arg0: i32) -> (i32, i32) {
    %c0_i32 = arith.constant 0 : i32
    %c0_i32_0 = arith.constant 0 : i32
    return %arg0, %c0_i32 : i32, i32
  }
  func.func @transform_2(%arg0: i32) -> (i32, i32, i32) {
    %c0_i32 = arith.constant 0 : i32
    %c0_i32_0 = arith.constant 0 : i32
    %c0_i32_1 = arith.constant 0 : i32
    %c0_i32_2 = arith.constant 0 : i32
    return %c0_i32, %c0_i32_0, %c0_i32_1 : i32, i32, i32
  }
  func.func @transform_3(%arg0: i32) -> (i32, i32, i32) {
    %c0_i32 = arith.constant 0 : i32
    %c0_i32_0 = arith.constant 0 : i32
    %c0_i32_1 = arith.constant 0 : i32
    %c0_i32_2 = arith.constant 0 : i32
    return %c0_i32, %c0_i32_0, %c0_i32_1 : i32, i32, i32
  }
  func.func @transform_4(%arg0: i32) -> (i32, i32, i32) {
    %c0_i32 = arith.constant 0 : i32
    %c0_i32_0 = arith.constant 0 : i32
    %c0_i32_1 = arith.constant 0 : i32
    %c0_i32_2 = arith.constant 0 : i32
    return %c0_i32, %c0_i32_0, %c0_i32_1 : i32, i32, i32
  }
  func.func @transform_5(%arg0: i32) -> (i32, i32, i32) {
    %c0_i32 = arith.constant 0 : i32
    %c0_i32_0 = arith.constant 0 : i32
    %c0_i32_1 = arith.constant 0 : i32
    %c0_i32_2 = arith.constant 0 : i32
    return %c0_i32, %c0_i32_0, %c0_i32_1 : i32, i32, i32
  }
  func.func @transform_6(%arg0: i32) -> (i32, i32) {
    %c0_i32 = arith.constant 0 : i32
    %c0_i32_0 = arith.constant 0 : i32
    return %arg0, %c0_i32 : i32, i32
  }
}

</mosaic_0001>

<bundles_post_ra>
// kernel: _lambda_.1
= control target key start
LH: loop header
LB: loop body
LE: loop exit
PB: predicated region body
PF: predicated region fallthrough
CT: control target
= control target key end

     0   :  { %11 = vsyncpa [#allocation3], 0  ;;  %s2131_s0 = inlined_call_operand.vmem [shape: f32[8,128], index: 0, kind: input, shape index: {}]   ;;  %s2132_s1 = inlined_call_operand.vmem [shape: f32[8,128], index: 1, kind: input, shape index: {}]   ;;  %s2133_s2 = inlined_call_operand.hbm [shape: f32[3,128,384], index: 2, kind: input, shape index: {}]   ;;  %s2134_s3 = inlined_call_operand.vmem [shape: f32[3,1,384], index: 3, kind: input, shape index: {}]   ;;  %s2135_s4 = inlined_call_operand.hbm [shape: f32[3,384,128], index: 4, kind: input, shape index: {}]   ;;  %s2136_s5 = inlined_call_operand.vmem [shape: f32[3,1,128], index: 5, kind: input, shape index: {}]   ;;  %s2137_s6 = inlined_call_operand.vmem [shape: f32[8,128], index: 6, kind: output, shape index: {}]  }
   0x1   :  { %12 = vsyncpa [#allocation5], 0  ;;  %s1934_s21 = smov [#allocation2]   ;;  %s1886_s25 = scalar_lea.hbm %s2133_s2, 18432 }
   0x2   :  { %s22_s22 = sshll.u32 %s1934_s21, 4  ;;  %p1887_p0 = scmp.ne.s32.totalorder %s2133_s2, %s1886_s25  ;;  %s23_s22 = int_to_ptr.vmem [resolvable:$true] %s22_s22 }
   0x3   :  { %p1890_p1 = scmp.lt.u32.totalorder %s1886_s25, %s2133_s2 }
   0x5   :  { %p1892_p2 = pnand %p1890_p1, %p1887_p0 }
   0x7   :  { %1895 = shalt.err (!%p1892_p2)
}
   0x8   :  { %s1896_s30 = scalar_lea.vmem %s23_s22, 18432  ;;  %p1901_p4 = scmp.lt.s32.totalorder %s23_s22, %s23_s22 }
   0x9   :  { %p1897_p3 = scmp.ne.s32.totalorder %s23_s22, %s1896_s30  ;;  %p1902_p5 = scmp.lt.s32.totalorder %s1896_s30, %s1896_s30 }
   0xb   :  { %p1903_p6 = por %p1902_p5, %p1901_p4 }
   0xd   :  { %p1904_p7 = pnand %p1903_p6, %p1897_p3 }
   0xf   :  { %1907 = shalt.err (!%p1904_p7)
}
  0x10   :  { %s1935_s7 = smov 384   ;;  %s1936_s8 = smov 24  }
  0x11   :  { %28 = dma.hbm_to_vmem [thread:$0]  %s2133_s2, 18432, %s23_s22, [#allocation3], %s1935_s7, %s1935_s7, %s1936_s8  }
  0x12   :  { %s1937_s11 = smov [#allocation4]   ;;  %s1908_s15 = scalar_lea.hbm %s2135_s4, 18432 }
  0x13   :  { %s36_s12 = sshll.u32 %s1937_s11, 4  ;;  %p1909_p8 = scmp.ne.s32.totalorder %s2135_s4, %s1908_s15  ;;  %s37_s12 = int_to_ptr.vmem [resolvable:$true] %s36_s12 }
  0x14   :  { %p1912_p9 = scmp.lt.u32.totalorder %s1908_s15, %s2135_s4 }
  0x16   :  { %p1914_p10 = pnand %p1912_p9, %p1909_p8 }
  0x18   :  { %1917 = shalt.err (!%p1914_p10)
}
  0x19   :  { %s1918_s20 = scalar_lea.vmem %s37_s12, 18432  ;;  %p1923_p12 = scmp.lt.s32.totalorder %s37_s12, %s37_s12 }
  0x1a   :  { %p1919_p11 = scmp.ne.s32.totalorder %s37_s12, %s1918_s20  ;;  %p1924_p13 = scmp.lt.s32.totalorder %s1918_s20, %s1918_s20 }
  0x1c   :  { %p1925_p0 = por %p1924_p13, %p1923_p12 }
  0x1e   :  { %p1926_p1 = pnand %p1925_p0, %p1919_p11 }
  0x20   :  { %1929 = shalt.err (!%p1926_p1)
}
  0x21   :  { %s1938_s2 = smov 128   ;;  %s1939_s21 = smov 8  }
  0x22   :  { %42 = dma.hbm_to_vmem [thread:$0]  %s2135_s4, 18432, %s37_s12, [#allocation5], %s1938_s2, %s1938_s2, %s1939_s21  }
  0x23   :  { %1930 = dma.done.wait [#allocation3], 18432  }
  0x24   :  { %1931 = vsyncadd [#allocation3], 4294948864 }
  0x25   :  { %1932 = dma.done.wait [#allocation5], 18432  }
  0x26   :  { %1933 = vsyncadd [#allocation5], 4294948864  ;;  %v1940_v0 = vmov 0.0|0.0   ;;  %v1941_v1 = vmov 0.0   ;;  %vm1942_vm0 = vmmov 0   ;;  %v54_v2 = vld [vmem:[#allocation2 + $0x8] sm:$0xff] }
  0x27   :  { %1597 = vmatprep.subr.bf16.mxu1 %v1940_v0  ;;  %182 = vmatprep.mubr.f32.mxu0 %v1941_v1  ;;  %v57_v3 = vld [vmem:[#allocation2 + $0x20] sm:$0xff]  ;;  %v56_v6 = vld [vmem:[#allocation2 + $0x18] sm:$0xff]  ;;  %v55_v7 = vld [vmem:[#allocation2 + $0x10] sm:$0xff] }
  0x28   :  { %1422 = vmatprep.mubr.msk.f32.mxu1 %vm1942_vm0, %v1941_v1  ;;  %v53_v4 = vld [vmem:[#allocation2] sm:$0xff]  ;;  %v1565_v5 = vpack.c.bf16 %v57_v3, %v54_v2  ;;  %v58_v8 = vld [vmem:[#allocation2 + $0x28] sm:$0xff]  ;;  %v60_v11 = vld [vmem:[#allocation2 + $0x38] sm:$0xff] }
  0x29   :  { %v1567_v9 = vpack.c.bf16 %v56_v6, %v53_v4  ;;  %v1598_v10 = vpack.c.bf16 %v58_v8, %v55_v7  ;;  %v63_v12 = vld [vmem:[#allocation2 + $0x50] sm:$0xff]  ;;  %v62_v15 = vld [vmem:[#allocation2 + $0x48] sm:$0xff]  ;;  %v61_v16 = vld [vmem:[#allocation2 + $0x40] sm:$0xff] }
  0x2a   :  { %v59_v13 = vld [vmem:[#allocation2 + $0x30] sm:$0xff]  ;;  %1566 = vmatprep.subr.bf16.mxu0 %v1565_v5  ;;  %v1569_v14 = vpack.c.bf16 %v63_v12, %v60_v11  ;;  %v64_v17 = vld [vmem:[#allocation2 + $0x58] sm:$0xff]  ;;  %v66_v20 = vld [vmem:[#allocation2 + $0x68] sm:$0xff] }
  0x2b   :  { %1568 = vmatpush1.bf16.msra.mxu0 %v1567_v9  ;;  %1599 = vmatpush3.bf16.msra.mxu1 %v1598_v10  ;;  %v1571_v18 = vpack.c.bf16 %v62_v15, %v59_v13  ;;  %v1601_v19 = vpack.c.bf16 %v64_v17, %v61_v16  ;;  %v69_v21 = vld [vmem:[#allocation2 + $0x80] sm:$0xff]  ;;  %v68_v24 = vld [vmem:[#allocation2 + $0x78] sm:$0xff]  ;;  %v67_v25 = vld [vmem:[#allocation2 + $0x70] sm:$0xff] }
  0x2c   :  { %v65_v22 = vld [vmem:[#allocation2 + $0x60] sm:$0xff]  ;;  %1570 = vmatprep.subr.bf16.mxu0 %v1569_v14  ;;  %1600 = vmatprep.subr.bf16.mxu1 %v1940_v0  ;;  %v1573_v23 = vpack.c.bf16 %v69_v21, %v66_v20  ;;  %v70_v26 = vld [vmem:[#allocation2 + $0x88] sm:$0xff]  ;;  %v72_v27 = vld [vmem:[#allocation2 + $0x98] sm:$0xff] }
  0x2d   :  { %v75_v28 = vld [vmem:[#allocation2 + $0xb0] sm:$0xff]  ;;  %v1575_v29 = vpack.c.bf16 %v68_v24, %v65_v22  ;;  %v1604_v30 = vpack.c.bf16 %v70_v26, %v67_v25  ;;  %v74_v33 = vld [vmem:[#allocation2 + $0xa8] sm:$0xff]  ;;  %v73_v34 = vld [vmem:[#allocation2 + $0xa0] sm:$0xff] }
  0x2e   :  { %v71_v31 = vld [vmem:[#allocation2 + $0x90] sm:$0xff]  ;;  %v1577_v32 = vpack.c.bf16 %v75_v28, %v72_v27  ;;  %v76_v35 = vld [vmem:[#allocation2 + $0xb8] sm:$0xff]  ;;  %v78_v36 = vld [vmem:[#allocation2 + $0xc8] sm:$0xff] }
  0x2f   :  { %1572 = vmatpush1.bf16.msra.mxu0 %v1571_v18  ;;  %1602 = vmatpush3.bf16.msra.mxu1 %v1601_v19  ;;  %v81_v37 = vld [vmem:[#allocation2 + $0xe0] sm:$0xff]  ;;  %v1579_v38 = vpack.c.bf16 %v74_v33, %v71_v31  ;;  %v1607_v39 = vpack.c.bf16 %v76_v35, %v73_v34  ;;  %v80_v42 = vld [vmem:[#allocation2 + $0xd8] sm:$0xff]  ;;  %v79_v43 = vld [vmem:[#allocation2 + $0xd0] sm:$0xff] }
  0x30   :  { %1574 = vmatprep.subr.bf16.mxu0 %v1573_v23  ;;  %1603 = vmatprep.subr.bf16.mxu1 %v1940_v0  ;;  %v77_v40 = vld [vmem:[#allocation2 + $0xc0] sm:$0xff]  ;;  %v1581_v41 = vpack.c.bf16 %v81_v37, %v78_v36  ;;  %v82_v44 = vld [vmem:[#allocation2 + $0xe8] sm:$0xff]  ;;  %v84_v45 = vld [vmem:[#allocation2 + $0xf8] sm:$0xff] }
  0x31   :  { %v87_v46 = vld [vmem:[#allocation2 + $0x110] sm:$0xff]  ;;  %v1583_v47 = vpack.c.bf16 %v80_v42, %v77_v40  ;;  %v1610_v48 = vpack.c.bf16 %v82_v44, %v79_v43  ;;  %v86_v51 = vld [vmem:[#allocation2 + $0x108] sm:$0xff]  ;;  %v85_v52 = vld [vmem:[#allocation2 + $0x100] sm:$0xff] }
  0x32   :  { %v83_v49 = vld [vmem:[#allocation2 + $0xf0] sm:$0xff]  ;;  %v1585_v50 = vpack.c.bf16 %v87_v46, %v84_v45  ;;  %v88_v53 = vld [vmem:[#allocation2 + $0x118] sm:$0xff]  ;;  %v90_v54 = vld [vmem:[#allocation2 + $0x128] sm:$0xff] }
  0x33   :  { %1576 = vmatpush1.bf16.msra.mxu0 %v1575_v29  ;;  %1605 = vmatpush3.bf16.msra.mxu1 %v1604_v30  ;;  %v93_v55 = vld [vmem:[#allocation2 + $0x140] sm:$0xff]  ;;  %v1587_v56 = vpack.c.bf16 %v86_v51, %v83_v49  ;;  %v1613_v57 = vpack.c.bf16 %v88_v53, %v85_v52  ;;  %v92_v60 = vld [vmem:[#allocation2 + $0x138] sm:$0xff]  ;;  %v91_v61 = vld [vmem:[#allocation2 + $0x130] sm:$0xff] }
  0x34   :  { %1578 = vmatprep.subr.bf16.mxu0 %v1577_v32  ;;  %1606 = vmatprep.subr.bf16.mxu1 %v1940_v0  ;;  %v89_v58 = vld [vmem:[#allocation2 + $0x120] sm:$0xff]  ;;  %v1589_v59 = vpack.c.bf16 %v93_v55, %v90_v54  ;;  %v94_v62 = vld [vmem:[#allocation2 + $0x148] sm:$0xff]  ;;  %v96_v63 = vld [vmem:[#allocation2 + $0x158] sm:$0xff] }
  0x35   :  { %v99_v2 = vld [vmem:[#allocation2 + $0x170] sm:$0xff]  ;;  %v1591_v3 = vpack.c.bf16 %v92_v60, %v89_v58  ;;  %v1616_v4 = vpack.c.bf16 %v94_v62, %v91_v61  ;;  %v98_v7 = vld [vmem:[#allocation2 + $0x168] sm:$0xff]  ;;  %v97_v8 = vld [vmem:[#allocation2 + $0x160] sm:$0xff] }
  0x36   :  { %v95_v5 = vld [vmem:[#allocation2 + $0x150] sm:$0xff]  ;;  %v1593_v6 = vpack.c.bf16 %v99_v2, %v96_v63  ;;  %v100_v9 = vld [vmem:[#allocation2 + $0x178] sm:$0xff]  ;;  %v278_v10 = vld [vmem:[#allocation4 + $0x80] sm:$0xff] }
  0x37   :  { %1580 = vmatpush1.bf16.msra.mxu0 %v1579_v38  ;;  %1608 = vmatpush3.bf16.msra.mxu1 %v1607_v39  ;;  %v279_v11 = vld [vmem:[#allocation4 + $0x88] sm:$0xff]  ;;  %v1595_v12 = vpack.c.bf16 %v98_v7, %v95_v5  ;;  %v1619_v13 = vpack.c.bf16 %v100_v9, %v97_v8  ;;  %v294_v14 = vld [vmem:[#allocation4 + $0x100] sm:$0xff]  ;;  %v280_v19 = vld [vmem:[#allocation4 + $0x90] sm:$0xff] }
  0x38   :  { %1582 = vmatprep.subr.bf16.mxu0 %v1581_v41  ;;  %1609 = vmatprep.subr.bf16.mxu1 %v1940_v0  ;;  %v295_v15 = vld [vmem:[#allocation4 + $0x108] sm:$0xff]  ;;  %v1621_v16 = vpack.c.bf16 %v279_v11, %v278_v10  ;;  %v262_v17 = vld [vmem:[#allocation4] sm:$0xff]  ;;  %v281_v20 = vld [vmem:[#allocation4 + $0x98] sm:$0xff] }
  0x39   :  { %v263_v18 = vld [vmem:[#allocation4 + $0x8] sm:$0xff]  ;;  %v2016_v21 = vld [vmem:[%s2131_s0] sm:$0xff]  ;;  %v1654_v22 = vpack.c.bf16 %v295_v15, %v294_v14  ;;  %v296_v23 = vld [vmem:[#allocation4 + $0x110] sm:$0xff]  ;;  %v1625_v26 = vpack.c.bf16 %v281_v20, %v280_v19 }
  0x3a   :  { %v297_v24 = vld [vmem:[#allocation4 + $0x118] sm:$0xff]  ;;  %v1623_v25 = vpack.c.bf16 %v263_v18, %v262_v17  ;;  %v264_v27 = vld [vmem:[#allocation4 + $0x10] sm:$0xff]  ;;  %v282_v29 = vld [vmem:[#allocation4 + $0xa0] sm:$0xff] }
  0x3b   :  { %1584 = vmatpush1.bf16.msra.mxu0 %v1583_v47  ;;  %1611 = vmatpush3.bf16.msra.mxu1 %v1610_v48  ;;  %v265_v28 = vld [vmem:[#allocation4 + $0x18] sm:$0xff]  ;;  %v283_v30 = vld [vmem:[#allocation4 + $0xa8] sm:$0xff]  ;;  %v1657_v31 = vpack.c.bf16 %v297_v24, %v296_v23  ;;  %v298_v32 = vld [vmem:[#allocation4 + $0x120] sm:$0xff] }
  0x3c   :  { %1586 = vmatprep.subr.bf16.mxu0 %v1585_v50  ;;  %1612 = vmatprep.subr.bf16.mxu1 %v1940_v0  ;;  %v299_v33 = vld [vmem:[#allocation4 + $0x128] sm:$0xff]  ;;  %v1627_v34 = vpack.c.bf16 %v265_v28, %v264_v27  ;;  %v1629_v35 = vpack.c.bf16 %v283_v30, %v282_v29  ;;  %v266_v36 = vld [vmem:[#allocation4 + $0x20] sm:$0xff]  ;;  %v284_v38 = vld [vmem:[#allocation4 + $0xb0] sm:$0xff] }
  0x3d   :  { %v267_v37 = vld [vmem:[#allocation4 + $0x28] sm:$0xff]  ;;  %v285_v39 = vld [vmem:[#allocation4 + $0xb8] sm:$0xff]  ;;  %v1660_v40 = vpack.c.bf16 %v299_v33, %v298_v32  ;;  %v300_v41 = vld [vmem:[#allocation4 + $0x130] sm:$0xff] }
  0x3e   :  { %v301_v42 = vld [vmem:[#allocation4 + $0x138] sm:$0xff]  ;;  %v1631_v43 = vpack.c.bf16 %v267_v37, %v266_v36  ;;  %v1633_v44 = vpack.c.bf16 %v285_v39, %v284_v38  ;;  %v268_v45 = vld [vmem:[#allocation4 + $0x30] sm:$0xff]  ;;  %v286_v47 = vld [vmem:[#allocation4 + $0xc0] sm:$0xff] }
  0x3f   :  { %1588 = vmatpush1.bf16.msra.mxu0 %v1587_v56  ;;  %1614 = vmatpush3.bf16.msra.mxu1 %v1613_v57  ;;  %v269_v46 = vld [vmem:[#allocation4 + $0x38] sm:$0xff]  ;;  %v287_v48 = vld [vmem:[#allocation4 + $0xc8] sm:$0xff]  ;;  %v1663_v49 = vpack.c.bf16 %v301_v42, %v300_v41  ;;  %v302_v50 = vld [vmem:[#allocation4 + $0x140] sm:$0xff] }
  0x40   :  { %1590 = vmatprep.subr.bf16.mxu0 %v1589_v59  ;;  %1615 = vmatprep.subr.bf16.mxu1 %v1940_v0  ;;  %v303_v51 = vld [vmem:[#allocation4 + $0x148] sm:$0xff]  ;;  %v1635_v52 = vpack.c.bf16 %v269_v46, %v268_v45  ;;  %v1637_v53 = vpack.c.bf16 %v287_v48, %v286_v47  ;;  %v270_v54 = vld [vmem:[#allocation4 + $0x40] sm:$0xff]  ;;  %v288_v56 = vld [vmem:[#allocation4 + $0xd0] sm:$0xff] }
  0x41   :  { %v271_v55 = vld [vmem:[#allocation4 + $0x48] sm:$0xff]  ;;  %v289_v57 = vld [vmem:[#allocation4 + $0xd8] sm:$0xff]  ;;  %v1666_v58 = vpack.c.bf16 %v303_v51, %v302_v50  ;;  %v304_v59 = vld [vmem:[#allocation4 + $0x150] sm:$0xff]  ;;  %v103_v50 = vlaneseq }
  0x42   :  { %v305_v60 = vld [vmem:[#allocation4 + $0x158] sm:$0xff]  ;;  %v1639_v61 = vpack.c.bf16 %v271_v55, %v270_v54  ;;  %v1641_v62 = vpack.c.bf16 %v289_v57, %v288_v56  ;;  %v272_v63 = vld [vmem:[#allocation4 + $0x50] sm:$0xff]  ;;  %v307_v7 = vld [vmem:[#allocation4 + $0x168] sm:$0xff] }
  0x43   :  { %1592 = vmatpush1.bf16.msra.mxu0 %v1591_v3  ;;  %1617 = vmatpush3.bf16.msra.mxu1 %v1616_v4  ;;  %v273_v2 = vld [vmem:[#allocation4 + $0x58] sm:$0xff]  ;;  %v290_v3 = vld [vmem:[#allocation4 + $0xe0] sm:$0xff]  ;;  %v291_v4 = vld [vmem:[#allocation4 + $0xe8] sm:$0xff]  ;;  %v1669_v5 = vpack.c.bf16 %v305_v60, %v304_v59  ;;  %v2042_v51 = vshrl.u32 %v103_v50, 7 }
  0x44   :  { %1594 = vmatprep.subr.bf16.mxu0 %v1593_v6  ;;  %1618 = vmatprep.subr.bf16.mxu1 %v1940_v0  ;;  %v306_v6 = vld [vmem:[#allocation4 + $0x160] sm:$0xff]  ;;  %v1643_v8 = vpack.c.bf16 %v273_v2, %v272_v63  ;;  %v1645_v9 = vpack.c.bf16 %v291_v4, %v290_v3  ;;  %v275_v11 = vld [vmem:[#allocation4 + $0x68] sm:$0xff]  ;;  %v309_v14 = vld [vmem:[#allocation4 + $0x178] sm:$0xff] }
  0x45   :  { %v274_v10 = vld [vmem:[#allocation4 + $0x60] sm:$0xff]  ;;  %v462_v17 = vld [vmem:[#allocation2 + $0x190] sm:$0xff]  ;;  %v465_v18 = vld [vmem:[#allocation2 + $0x1a8] sm:$0xff]  ;;  %v2052_v55 = vsub.s32 1, %v2042_v51 }
  0x46   :  { %v1647_v15 = vpack.c.bf16 %v275_v11, %v274_v10  ;;  %v1710_v19 = vpack.c.bf16 %v465_v18, %v462_v17  ;;  %v468_v20 = vld [vmem:[#allocation2 + $0x1c0] sm:$0xff]  ;;  %v474_v24 = vld [vmem:[#allocation2 + $0x1f0] sm:$0xff]  ;;  %v483_v28 = vld [vmem:[#allocation2 + $0x238] sm:$0xff] }
  0x47   :  { %1596 = vmatpush1.bf16.msra.mxu0 %v1595_v12  ;;  %1620 = vmatpush3.bf16.msra.mxu1 %v1619_v13  ;;  %v1672_v12 = vpack.c.bf16 %v307_v7, %v306_v6  ;;  %v308_v13 = vld [vmem:[#allocation4 + $0x170] sm:$0xff]  ;;  %v480_v27 = vld [vmem:[#allocation2 + $0x220] sm:$0xff]  ;;  %v489_v30 = vld [vmem:[#allocation2 + $0x268] sm:$0xff] }
  0x48   :  { %1653 = vmatprep.subr.bf16.mxu1 %v1940_v0  ;;  %1622 = vmatprep.subr.bf16.mxu0 %v1621_v16  ;;  %v1675_v16 = vpack.c.bf16 %v309_v14, %v308_v13  ;;  %v1719_v29 = vpack.c.bf16 %v483_v28, %v480_v27  ;;  %v492_v32 = vld [vmem:[#allocation2 + $0x280] sm:$0xff]  ;;  %v495_v33 = vld [vmem:[#allocation2 + $0x298] sm:$0xff]  ;;  %v501_v36 = vld [vmem:[#allocation2 + $0x2c8] sm:$0xff] }
  0x49   :  { %v292_v38 = vld [vmem:[#allocation4 + $0xf0] sm:$0xff]  ;;  %v293_v39 = vld [vmem:[#allocation4 + $0xf8] sm:$0xff]  ;;  %v461_v47 = vld [vmem:[#allocation2 + $0x188] sm:$0xff] }
  0x4a   :  { %183 = vmatmul.mubr.f32.vlgmr.msra.gmra.mrb[0].mxu0 %v2016_v21  ;;  %1423 = vmatmul.mubr.f32.vlgmr.msra.gmra.mrb[0].mxu1 %v2016_v21  ;;  %v1649_v41 = vpack.c.bf16 %v293_v39, %v292_v38  ;;  %v507_v42 = vld [vmem:[#allocation2 + $0x2f8] sm:$0xff]  ;;  %v464_v48 = vld [vmem:[#allocation2 + $0x1a0] sm:$0xff]  ;;  %v704_v60 = vld [vmem:[#allocation4 + $0x288] sm:$0xff] }
  0x4b   :  { %1655 = vmatpush3.bf16.msra.mxu1 %v1654_v22  ;;  %1457 = vmatprep.mubr.msk.f32.mxu1 %vm1942_vm0, %v1941_v1  ;;  %v471_v22 = vld [vmem:[#allocation2 + $0x1d8] sm:$0xff]  ;;  %v101_v54 = vld [vmem:[%s2134_s3] sm:$0x7]  ;;  %v470_v11 = vld [vmem:[#allocation2 + $0x1d0] sm:$0xff] }
  0x4c   :  { %1656 = vmatprep.subr.bf16.mxu1 %v1940_v0  ;;  %1624 = vmatpush3.bf16.msra.mxu0 %v1623_v25  ;;  %v1713_v23 = vpack.c.bf16 %v471_v22, %v468_v20  ;;  %v477_v25 = vld [vmem:[#allocation2 + $0x208] sm:$0xff]  ;;  %v703_v59 = vld [vmem:[#allocation4 + $0x280] sm:$0xff]  ;;  %v463_v6 = vld [vmem:[#allocation2 + $0x198] sm:$0xff] }
  0x4d   :  { %1626 = vmatprep.subr.bf16.mxu0 %v1625_v26  ;;  %v1716_v26 = vpack.c.bf16 %v477_v25, %v474_v24  ;;  %v2061_v63 = vld [vmem:[%s2132_s1] sm:$0xff]  ;;  %v467_v10 = vld [vmem:[#allocation2 + $0x1b8] sm:$0xff]  ;;  %v705_v14 = vld [vmem:[#allocation4 + $0x290] sm:$0xff] }
  0x4e   :  { %v466_v20 = vld [vmem:[#allocation2 + $0x1b0] sm:$0xff]  ;;  %v469_v22 = vld [vmem:[#allocation2 + $0x1c8] sm:$0xff]  ;;  %v476_v25 = vld [vmem:[#allocation2 + $0x200] sm:$0xff] }
  0x4f   :  { %1658 = vmatpush3.bf16.msra.mxu1 %v1657_v31  ;;  %v473_v24 = vld [vmem:[#allocation2 + $0x1e8] sm:$0xff]  ;;  %v1683_v28 = vpack.c.bf16 %v469_v22, %v466_v20  ;;  %v478_v38 = vld [vmem:[#allocation2 + $0x210] sm:$0xff]  ;;  %v491_v50 = vld [vmem:[#allocation2 + $0x278] sm:$0xff] }
  0x50   :  { %1659 = vmatprep.subr.bf16.mxu1 %v1940_v0  ;;  %1628 = vmatpush3.bf16.msra.mxu0 %v1627_v34  ;;  %v1725_v34 = vpack.c.bf16 %v495_v33, %v492_v32  ;;  %v708_v27 = vld [vmem:[#allocation4 + $0x2a8] sm:$0xff]  ;;  %v479_v32 = vld [vmem:[#allocation2 + $0x218] sm:$0xff]  ;;  %v482_v33 = vld [vmem:[#allocation2 + $0x230] sm:$0xff] }
  0x51   :  { %1630 = vmatprep.subr.bf16.mxu0 %v1629_v35  ;;  %v498_v35 = vld [vmem:[#allocation2 + $0x2b0] sm:$0xff]  ;;  %v481_v39 = vld [vmem:[#allocation2 + $0x228] sm:$0xff] }
  0x52   :  { %v1728_v37 = vpack.c.bf16 %v501_v36, %v498_v35  ;;  %v710_v35 = vld [vmem:[#allocation4 + $0x2b8] sm:$0xff] }
  0x53   :  { %1661 = vmatpush3.bf16.msra.mxu1 %v1660_v40  ;;  %v504_v40 = vld [vmem:[#allocation2 + $0x2e0] sm:$0xff] }
  0x54   :  { %1662 = vmatprep.subr.bf16.mxu1 %v1940_v0  ;;  %1632 = vmatpush3.bf16.msra.mxu0 %v1631_v43  ;;  %v276_v43 = vld [vmem:[#allocation4 + $0x70] sm:$0xff]  ;;  %v1731_v45 = vpack.c.bf16 %v507_v42, %v504_v40  ;;  %v488_v42 = vld [vmem:[#allocation2 + $0x260] sm:$0xff] }
  0x55   :  { %1634 = vmatprep.subr.bf16.mxu0 %v1633_v44  ;;  %v277_v44 = vld [vmem:[#allocation4 + $0x78] sm:$0xff] }
  0x56   :  { %v1651_v46 = vpack.c.bf16 %v277_v44, %v276_v43  ;;  %v711_v43 = vld [vmem:[#allocation4 + $0x2c0] sm:$0xff]  ;;  %v712_v44 = vld [vmem:[#allocation4 + $0x2c8] sm:$0xff] }
  0x57   :  { %1664 = vmatpush3.bf16.msra.mxu1 %v1663_v49  ;;  %v1677_v49 = vpack.c.bf16 %v464_v48, %v461_v47  ;;  %v484_v47 = vld [vmem:[#allocation2 + $0x240] sm:$0xff]  ;;  %v487_v48 = vld [vmem:[#allocation2 + $0x258] sm:$0xff] }
  0x58   :  { %1665 = vmatprep.subr.bf16.mxu1 %v1940_v0  ;;  %1636 = vmatpush3.bf16.msra.mxu0 %v1635_v52  ;;  %v2045_v52 = vsub.s32 0, %v2042_v51 }
  0x59   :  { %1638 = vmatprep.subr.bf16.mxu0 %v1637_v53  ;;  %v113_v53 = vsub.s32 2, %v2042_v51  ;;  %v1025_v51 = vld [vmem:[#allocation4 + $0x418] sm:$0xff] }
  0x5a   :  { %v106_v56 = vrot.slane %v101_v54, %v2045_v52 }
  0x5b   :  { %1667 = vmatpush3.bf16.msra.mxu1 %v1666_v58  ;;  %v114_v57 = vrot.slane %v101_v54, %v113_v53  ;;  %v110_v58 = vrot.slane %v101_v54, %v2052_v55  ;;  %v494_v54 = vld [vmem:[#allocation2 + $0x290] sm:$0xff] }
  0x5c   :  { %1668 = vmatprep.subr.bf16.mxu1 %v1940_v0  ;;  %1640 = vmatpush3.bf16.msra.mxu0 %v1639_v61 }
  0x5d   :  { %1642 = vmatprep.subr.bf16.mxu0 %v1641_v62 }
  0x5f   :  { %1670 = vmatpush3.bf16.msra.mxu1 %v1669_v5  ;;  %v460_v5 = vld [vmem:[#allocation2 + $0x180] sm:$0xff] }
  0x60   :  { %1671 = vmatprep.subr.bf16.mxu1 %v1940_v0  ;;  %1644 = vmatpush3.bf16.msra.mxu0 %v1643_v8  ;;  %v1679_v17 = vpack.c.bf16 %v463_v6, %v460_v5  ;;  %v716_v5 = vld [vmem:[#allocation4 + $0x2e8] sm:$0xff] }
  0x61   :  { %1646 = vmatprep.subr.bf16.mxu0 %v1645_v9  ;;  %v1766_v9 = vpack.c.bf16 %v704_v60, %v703_v59  ;;  %v1697_v59 = vpack.c.bf16 %v494_v54, %v491_v50  ;;  %v490_v60 = vld [vmem:[#allocation2 + $0x270] sm:$0xff]  ;;  %v679_v50 = vld [vmem:[#allocation4 + $0x1c0] sm:$0xff]  ;;  %v680_v54 = vld [vmem:[#allocation4 + $0x1c8] sm:$0xff] }
  0x63   :  { %1673 = vmatpush3.bf16.msra.mxu1 %v1672_v12 }
  0x64   :  { %1674 = vmatprep.subr.bf16.mxu1 %v1940_v0  ;;  %1648 = vmatpush3.bf16.msra.mxu0 %v1647_v15  ;;  %v706_v15 = vld [vmem:[#allocation4 + $0x298] sm:$0xff] }
  0x65   :  { %1650 = vmatprep.subr.bf16.mxu0 %v1649_v41  ;;  %v485_v41 = vld [vmem:[#allocation2 + $0x248] sm:$0xff] }
  0x67   :  { %1676 = vmatpush3.bf16.msra.mxu1 %v1675_v16 }
  0x68   :  { %1709 = vmatprep.subr.bf16.mxu1 %v1940_v0  ;;  %1652 = vmatpush3.bf16.msra.mxu0 %v1651_v46  ;;  %v1693_v46 = vpack.c.bf16 %v488_v42, %v485_v41  ;;  %v694_v41 = vld [vmem:[#allocation4 + $0x238] sm:$0xff] }
  0x69   :  { %1678 = vmatprep.subr.bf16.mxu0 %v1677_v49  ;;  %v1778_v49 = vpack.c.bf16 %v712_v44, %v711_v43  ;;  %v677_v44 = vld [vmem:[#allocation4 + $0x1b0] sm:$0xff] }
  0x6a   :  { %1458 = vmatmul.mubr.f32.vlgmr.msra.gmra.mrb[2].mxu1 %v2016_v21  ;;  %v486_v21 = vld [vmem:[#allocation2 + $0x250] sm:$0xff] }
  0x6b   :  { %1711 = vmatpush3.bf16.msra.mxu1 %v1710_v19  ;;  %1492 = vmatprep.mubr.msk.f32.mxu1 %vm1942_vm0, %v1941_v1  ;;  %v1722_v31 = vpack.c.bf16 %v489_v30, %v486_v21  ;;  %v1681_v19 = vpack.c.bf16 %v470_v11, %v467_v10  ;;  %v472_v21 = vld [vmem:[#allocation2 + $0x1e0] sm:$0xff]  ;;  %v475_v30 = vld [vmem:[#allocation2 + $0x1f8] sm:$0xff] }
  0x6c   :  { %1712 = vmatprep.subr.bf16.mxu1 %v1940_v0  ;;  %v1687_v36 = vpack.c.bf16 %v475_v30, %v472_v21  ;;  %v503_v11 = vld [vmem:[#allocation2 + $0x2d8] sm:$0xff]  ;;  %v689_v30 = vld [vmem:[#allocation4 + $0x210] sm:$0xff] }
  0x6f   :  { %1714 = vmatpush3.bf16.msra.mxu1 %v1713_v23  ;;  %v1769_v23 = vpack.c.bf16 %v706_v15, %v705_v14  ;;  %v717_v14 = vld [vmem:[#allocation4 + $0x2f0] sm:$0xff]  ;;  %v718_v15 = vld [vmem:[#allocation4 + $0x2f8] sm:$0xff] }
  0x70   :  { %1715 = vmatprep.subr.bf16.mxu1 %v1940_v0  ;;  %v1787_v20 = vpack.c.bf16 %v718_v15, %v717_v14  ;;  %v871_v15 = vld [vmem:[#allocation2 + $0x308] sm:$0xff] }
  0x73   :  { %1717 = vmatpush3.bf16.msra.mxu1 %v1716_v26  ;;  %v707_v26 = vld [vmem:[#allocation4 + $0x2a0] sm:$0xff] }
  0x74   :  { %1718 = vmatprep.subr.bf16.mxu1 %v1940_v0 }
  0x77   :  { %1720 = vmatpush3.bf16.msra.mxu1 %v1719_v29  ;;  %v1685_v29 = vpack.c.bf16 %v476_v25, %v473_v24  ;;  %v688_v24 = vld [vmem:[#allocation4 + $0x208] sm:$0xff] }
  0x78   :  { %1721 = vmatprep.subr.bf16.mxu1 %v1940_v0 }
  0x7b   :  { %1723 = vmatpush3.bf16.msra.mxu1 %v1722_v31  ;;  %v1772_v31 = vpack.c.bf16 %v708_v27, %v707_v26  ;;  %v671_v27 = vld [vmem:[#allocation4 + $0x180] sm:$0xff] }
  0x7c   :  { %1724 = vmatprep.subr.bf16.mxu1 %v1940_v0 }
  0x7f   :  { %1726 = vmatpush3.bf16.msra.mxu1 %v1725_v34  ;;  %v709_v34 = vld [vmem:[#allocation4 + $0x2b0] sm:$0xff] }
  0x80   :  { %1727 = vmatprep.subr.bf16.mxu1 %v1940_v0  ;;  %v1775_v40 = vpack.c.bf16 %v710_v35, %v709_v34  ;;  %v674_v34 = vld [vmem:[#allocation4 + $0x198] sm:$0xff]  ;;  %v691_v35 = vld [vmem:[#allocation4 + $0x220] sm:$0xff] }
  0x83   :  { %1729 = vmatpush3.bf16.msra.mxu1 %v1728_v37  ;;  %v1689_v37 = vpack.c.bf16 %v482_v33, %v479_v32  ;;  %v673_v33 = vld [vmem:[#allocation4 + $0x190] sm:$0xff] }
  0x84   :  { %1730 = vmatprep.subr.bf16.mxu1 %v1940_v0 }
  0x87   :  { %1732 = vmatpush3.bf16.msra.mxu1 %v1731_v45  ;;  %v1691_v45 = vpack.c.bf16 %v481_v39, %v478_v38  ;;  %v676_v38 = vld [vmem:[#allocation4 + $0x1a8] sm:$0xff] }
  0x88   :  { %1765 = vmatprep.subr.bf16.mxu1 %v1940_v0 }
 0x11d   :  { %v184_v61 = vpop.f32.mrb[0].mxu0  ;;  %v255_v62 = vpop.f32.mrb[0].mxu1 }
 0x11e   :  { %v185_v2 = vadd.f32 %v184_v61, %v106_v56  ;;  %v186_v3 = vpop.f32.mrb[1].mxu0  ;;  %v256_v4 = vadd.f32 %v255_v62, %v114_v57  ;;  %v1424_v7 = vpop.f32.mrb[1].mxu1  ;;  %v713_v56 = vld [vmem:[#allocation4 + $0x2d0] sm:$0xff]  ;;  %v714_v57 = vld [vmem:[#allocation4 + $0x2d8] sm:$0xff]  ;;  %v493_v61 = vld [vmem:[#allocation2 + $0x288] sm:$0xff] }
 0x11f   :  { %v187_v8 = vadd.f32 %v186_v3, %v110_v58  ;;  %v1695_v58 = vpack.c.bf16 %v487_v48, %v484_v47  ;;  %v1781_v62 = vpack.c.bf16 %v714_v57, %v713_v56  ;;  %v500_v3 = vld [vmem:[#allocation2 + $0x2c0] sm:$0xff]  ;;  %v1699_v6 = vpack.c.bf16 %v493_v61, %v490_v60  ;;  %v696_v47 = vld [vmem:[#allocation4 + $0x248] sm:$0xff]  ;;  %v697_v56 = vld [vmem:[#allocation4 + $0x250] sm:$0xff] }
 0x120   :  { %v259_v12 = vmax.f32 %v185_v2, 0.0  ;;  %v2063_v13 = vmin.f32 %v256_v4, 0.0  ;;  %v497_v2 = vld [vmem:[#allocation2 + $0x2a8] sm:$0xff]  ;;  %v715_v4 = vld [vmem:[#allocation4 + $0x2e0] sm:$0xff]  ;;  %v698_v57 = vld [vmem:[#allocation4 + $0x258] sm:$0xff] }
 0x121   :  { %v260_v16 = vmul.f32 %v187_v8, %v2061_v63  ;;  %v1701_v7 = vpack.c.bf16 %v500_v3, %v497_v2  ;;  %v496_v8 = vld [vmem:[#allocation2 + $0x2a0] sm:$0xff]  ;;  %v1784_v10 = vpack.c.bf16 %v716_v5, %v715_v4  ;;  %v681_v60 = vld [vmem:[#allocation4 + $0x1d0] sm:$0xff]  ;;  %v682_v61 = vld [vmem:[#allocation4 + $0x1d8] sm:$0xff] }
 0x122   :  { %v261_v18 = vmul.f32 %v259_v12, %v2061_v63  ;;  %1493 = vmatmul.mubr.f32.vlgmr.msra.gmra.mrb[4].mxu1 %v2063_v13  ;;  %v506_v12 = vld [vmem:[#allocation2 + $0x2f0] sm:$0xff]  ;;  %v700_v2 = vld [vmem:[#allocation4 + $0x268] sm:$0xff]  ;;  %v1755_v3 = vpack.c.bf16 %v682_v61, %v681_v60  ;;  %v683_v5 = vld [vmem:[#allocation4 + $0x1e0] sm:$0xff] }
 0x123   :  { %381 = vmatprep.mubr.f32.mxu0 %v260_v16  ;;  %1767 = vmatpush3.bf16.msra.mxu1 %v1766_v9  ;;  %v499_v9 = vld [vmem:[#allocation2 + $0x2b8] sm:$0xff]  ;;  %v882_v60 = vld [vmem:[#allocation2 + $0x390] sm:$0xff]  ;;  %v884_v61 = vld [vmem:[#allocation2 + $0x3a8] sm:$0xff] }
 0x124   :  { %382 = vmatmul.mubr.f32.vlgmr.msra.gmra.mrb[2].mxu0 %v261_v18  ;;  %1768 = vmatprep.subr.bf16.mxu1 %v1940_v0  ;;  %v1703_v16 = vpack.c.bf16 %v499_v9, %v496_v8  ;;  %v502_v18 = vld [vmem:[#allocation2 + $0x2d0] sm:$0xff]  ;;  %v702_v9 = vld [vmem:[#allocation4 + $0x278] sm:$0xff] }
 0x125   :  { %1680 = vmatpush1.bf16.msra.mxu0 %v1679_v17  ;;  %1527 = vmatprep.mubr.msk.f32.mxu1 %vm1942_vm0, %v1941_v1  ;;  %v1705_v17 = vpack.c.bf16 %v506_v12, %v503_v11  ;;  %v701_v8 = vld [vmem:[#allocation4 + $0x270] sm:$0xff]  ;;  %v686_v12 = vld [vmem:[#allocation4 + $0x1f8] sm:$0xff] }
 0x126   :  { %1682 = vmatprep.subr.bf16.mxu0 %v1681_v19  ;;  %590 = vmatprep.mubr.f32.mxu0 %v1941_v1  ;;  %v505_v19 = vld [vmem:[#allocation2 + $0x2e8] sm:$0xff]  ;;  %v685_v11 = vld [vmem:[#allocation4 + $0x1f0] sm:$0xff] }
 0x127   :  { %1770 = vmatpush3.bf16.msra.mxu1 %v1769_v23  ;;  %v1707_v22 = vpack.c.bf16 %v505_v19, %v502_v18  ;;  %v687_v23 = vld [vmem:[#allocation4 + $0x200] sm:$0xff]  ;;  %v1763_v14 = vpack.c.bf16 %v686_v12, %v685_v11  ;;  %v890_v11 = vld [vmem:[#allocation2 + $0x3f0] sm:$0xff]  ;;  %v892_v12 = vld [vmem:[#allocation2 + $0x408] sm:$0xff] }
 0x128   :  { %1771 = vmatprep.subr.bf16.mxu1 %v1940_v0  ;;  %v1733_v26 = vpack.c.bf16 %v688_v24, %v687_v23  ;;  %v1193_v23 = vld [vmem:[%s2136_s5] ss:$0 sm:$0xff] }
 0x129   :  { %1684 = vmatpush1.bf16.msra.mxu0 %v1683_v28  ;;  %v672_v28 = vld [vmem:[#allocation4 + $0x188] sm:$0xff] }
 0x12a   :  { %1686 = vmatprep.subr.bf16.mxu0 %v1685_v29  ;;  %v1735_v29 = vpack.c.bf16 %v672_v28, %v671_v27  ;;  %v2091_v28 = vld [vmem:[%s2134_s3 + $0x3] sm:$0x7] }
 0x12b   :  { %1773 = vmatpush3.bf16.msra.mxu1 %v1772_v31  ;;  %v690_v31 = vld [vmem:[#allocation4 + $0x218] sm:$0xff] }
 0x12c   :  { %1774 = vmatprep.subr.bf16.mxu1 %v1940_v0  ;;  %v1737_v32 = vpack.c.bf16 %v690_v31, %v689_v30  ;;  %v518_v30 = vrot.slane %v2091_v28, %v2052_v55 }
 0x12d   :  { %1688 = vmatpush1.bf16.msra.mxu0 %v1687_v36  ;;  %v1739_v36 = vpack.c.bf16 %v674_v34, %v673_v33 }
 0x12e   :  { %1690 = vmatprep.subr.bf16.mxu0 %v1689_v37  ;;  %v692_v37 = vld [vmem:[#allocation4 + $0x228] sm:$0xff] }
 0x12f   :  { %1776 = vmatpush3.bf16.msra.mxu1 %v1775_v40  ;;  %v1741_v39 = vpack.c.bf16 %v692_v37, %v691_v35  ;;  %v693_v40 = vld [vmem:[#allocation4 + $0x230] sm:$0xff]  ;;  %v870_v35 = vld [vmem:[#allocation2 + $0x300] sm:$0xff]  ;;  %v875_v37 = vld [vmem:[#allocation2 + $0x338] sm:$0xff] }
 0x130   :  { %1777 = vmatprep.subr.bf16.mxu1 %v1940_v0  ;;  %v1745_v43 = vpack.c.bf16 %v694_v41, %v693_v40 }
 0x131   :  { %1692 = vmatpush1.bf16.msra.mxu0 %v1691_v45  ;;  %v678_v45 = vld [vmem:[#allocation4 + $0x1b8] sm:$0xff] }
 0x132   :  { %1694 = vmatprep.subr.bf16.mxu0 %v1693_v46  ;;  %v695_v46 = vld [vmem:[#allocation4 + $0x240] sm:$0xff]  ;;  %v1747_v48 = vpack.c.bf16 %v678_v45, %v677_v44  ;;  %v874_v44 = vld [vmem:[#allocation2 + $0x330] sm:$0xff]  ;;  %v876_v45 = vld [vmem:[#allocation2 + $0x348] sm:$0xff] }
 0x133   :  { %1779 = vmatpush3.bf16.msra.mxu1 %v1778_v49  ;;  %v1749_v49 = vpack.c.bf16 %v696_v47, %v695_v46  ;;  %v879_v46 = vld [vmem:[#allocation2 + $0x368] sm:$0xff]  ;;  %v881_v47 = vld [vmem:[#allocation2 + $0x380] sm:$0xff] }
 0x134   :  { %1780 = vmatprep.subr.bf16.mxu1 %v1940_v0 }
 0x135   :  { %1696 = vmatpush1.bf16.msra.mxu0 %v1695_v58  ;;  %v1751_v58 = vpack.c.bf16 %v680_v54, %v679_v50  ;;  %v878_v50 = vld [vmem:[#allocation2 + $0x360] sm:$0xff]  ;;  %v880_v54 = vld [vmem:[#allocation2 + $0x378] sm:$0xff] }
 0x136   :  { %1698 = vmatprep.subr.bf16.mxu0 %v1697_v59  ;;  %v1753_v59 = vpack.c.bf16 %v698_v57, %v697_v56  ;;  %v883_v56 = vld [vmem:[#allocation2 + $0x398] sm:$0xff]  ;;  %v885_v57 = vld [vmem:[#allocation2 + $0x3b0] sm:$0xff] }
 0x137   :  { %1782 = vmatpush3.bf16.msra.mxu1 %v1781_v62  ;;  %v699_v62 = vld [vmem:[#allocation4 + $0x260] sm:$0xff] }
 0x138   :  { %1783 = vmatprep.subr.bf16.mxu1 %v1940_v0  ;;  %v1757_v4 = vpack.c.bf16 %v700_v2, %v699_v62  ;;  %v887_v62 = vld [vmem:[#allocation2 + $0x3c8] sm:$0xff]  ;;  %v889_v2 = vld [vmem:[#allocation2 + $0x3e0] sm:$0xff] }
 0x139   :  { %1700 = vmatpush1.bf16.msra.mxu0 %v1699_v6  ;;  %v684_v6 = vld [vmem:[#allocation4 + $0x1e8] sm:$0xff] }
 0x13a   :  { %1702 = vmatprep.subr.bf16.mxu0 %v1701_v7  ;;  %v1759_v7 = vpack.c.bf16 %v684_v6, %v683_v5  ;;  %v886_v5 = vld [vmem:[#allocation2 + $0x3c0] sm:$0xff]  ;;  %v888_v6 = vld [vmem:[#allocation2 + $0x3d8] sm:$0xff] }
 0x13b   :  { %1785 = vmatpush3.bf16.msra.mxu1 %v1784_v10  ;;  %v1761_v10 = vpack.c.bf16 %v702_v9, %v701_v8  ;;  %v893_v8 = vld [vmem:[#allocation2 + $0x410] sm:$0xff]  ;;  %v1807_v9 = vpack.c.bf16 %v888_v6, %v886_v5  ;;  %v1010_v5 = vld [vmem:[#allocation4 + $0x3a0] sm:$0xff]  ;;  %v1011_v6 = vld [vmem:[#allocation4 + $0x3a8] sm:$0xff] }
 0x13c   :  { %1786 = vmatprep.subr.bf16.mxu1 %v1940_v0 }
 0x13d   :  { %1704 = vmatpush1.bf16.msra.mxu0 %v1703_v16  ;;  %v2080_v25 = vpop.f32.mrb[2].mxu1  ;;  %v873_v16 = vld [vmem:[#allocation2 + $0x320] sm:$0xff] }
 0x13e   :  { %1706 = vmatprep.subr.bf16.mxu0 %v1705_v17  ;;  %v1459_v21 = vpop.f32.mrb[3].mxu1  ;;  %v1789_v17 = vpack.c.bf16 %v873_v16, %v871_v15  ;;  %v897_v15 = vld [vmem:[#allocation2 + $0x440] sm:$0xff]  ;;  %v1811_v16 = vpack.c.bf16 %v892_v12, %v890_v11  ;;  %v1013_v11 = vld [vmem:[#allocation4 + $0x3b8] sm:$0xff] }
 0x13f   :  { %1788 = vmatpush3.bf16.msra.mxu1 %v1787_v20 }
 0x141   :  { %1708 = vmatpush1.bf16.msra.mxu0 %v1707_v22 }
 0x142   :  { %1528 = vmatmul.mubr.f32.vlgmr.msra.gmra.mrb[6].mxu1 %v2063_v13  ;;  %1734 = vmatprep.subr.bf16.mxu0 %v1733_v26 }
 0x144   :  { %591 = vmatmul.mubr.f32.vlgmr.msra.gmra.mrb[4].mxu0 %v2063_v13  ;;  %v675_v13 = vld [vmem:[#allocation4 + $0x1a0] sm:$0xff] }
 0x145   :  { %1736 = vmatpush3.bf16.msra.mxu0 %v1735_v29  ;;  %v1743_v42 = vpack.c.bf16 %v676_v38, %v675_v13  ;;  %v514_v29 = vrot.slane %v2091_v28, %v2045_v52  ;;  %v877_v13 = vld [vmem:[#allocation2 + $0x350] sm:$0xff] }
 0x146   :  { %1738 = vmatprep.subr.bf16.mxu0 %v1737_v32 }
 0x149   :  { %1740 = vmatpush3.bf16.msra.mxu0 %v1739_v36  ;;  %v872_v36 = vld [vmem:[#allocation2 + $0x318] sm:$0xff] }
 0x14a   :  { %1742 = vmatprep.subr.bf16.mxu0 %v1741_v39  ;;  %v1791_v41 = vpack.c.bf16 %v872_v36, %v870_v35 }
 0x14d   :  { %1744 = vmatpush3.bf16.msra.mxu0 %v1743_v42 }
 0x14e   :  { %1746 = vmatprep.subr.bf16.mxu0 %v1745_v43  ;;  %v1793_v43 = vpack.c.bf16 %v877_v13, %v875_v37  ;;  %v1028_v13 = vld [vmem:[#allocation4 + $0x430] sm:$0xff] }
 0x151   :  { %1748 = vmatpush3.bf16.msra.mxu0 %v1747_v48  ;;  %v1795_v48 = vpack.c.bf16 %v876_v45, %v874_v44  ;;  %v1034_v45 = vld [vmem:[#allocation4 + $0x460] sm:$0xff] }
 0x152   :  { %1750 = vmatprep.subr.bf16.mxu0 %v1749_v49  ;;  %v1797_v49 = vpack.c.bf16 %v881_v47, %v879_v46  ;;  %v1035_v46 = vld [vmem:[#allocation4 + $0x468] sm:$0xff] }
 0x153   :  { %v1872_v47 = vpack.c.bf16 %v1035_v46, %v1034_v45  ;;  %v1197_v45 = vld [vmem:[%s2134_s3 + $0x6] sm:$0x7] }
 0x154   :  { %v908_v46 = vrot.slane %v1197_v45, %v2045_v52  ;;  %v1199_v52 = vld [vmem:[%s2136_s5 + $0x2] ss:$0 sm:$0xff] }
 0x155   :  { %1752 = vmatpush3.bf16.msra.mxu0 %v1751_v58  ;;  %v1799_v58 = vpack.c.bf16 %v880_v54, %v878_v50  ;;  %v1006_v54 = vld [vmem:[#allocation4 + $0x380] sm:$0xff] }
 0x156   :  { %1754 = vmatprep.subr.bf16.mxu0 %v1753_v59  ;;  %v1801_v59 = vpack.c.bf16 %v885_v57, %v883_v56  ;;  %v1007_v56 = vld [vmem:[#allocation4 + $0x388] sm:$0xff] }
 0x157   :  { %v1821_v57 = vpack.c.bf16 %v1007_v56, %v1006_v54 }
 0x159   :  { %1756 = vmatpush3.bf16.msra.mxu0 %v1755_v3  ;;  %v1803_v3 = vpack.c.bf16 %v884_v61, %v882_v60  ;;  %v1008_v61 = vld [vmem:[#allocation4 + $0x390] sm:$0xff]  ;;  %1822 = vmatprep.subr.bf16.mxu1 %v1821_v57 }
 0x15a   :  { %1758 = vmatprep.subr.bf16.mxu0 %v1757_v4  ;;  %v1805_v4 = vpack.c.bf16 %v889_v2, %v887_v62  ;;  %v1009_v62 = vld [vmem:[#allocation4 + $0x398] sm:$0xff]  ;;  %v992_v2 = vld [vmem:[#allocation4 + $0x310] sm:$0xff] }
 0x15d   :  { %1760 = vmatpush3.bf16.msra.mxu0 %v1759_v7  ;;  %v891_v7 = vld [vmem:[#allocation2 + $0x3f8] sm:$0xff] }
 0x15e   :  { %1762 = vmatprep.subr.bf16.mxu0 %v1761_v10  ;;  %v1809_v10 = vpack.c.bf16 %v893_v8, %v891_v7  ;;  %v994_v8 = vld [vmem:[#allocation4 + $0x320] sm:$0xff] }
 0x161   :  { %1764 = vmatpush3.bf16.msra.mxu0 %v1763_v14  ;;  %v895_v14 = vld [vmem:[#allocation2 + $0x428] sm:$0xff] }
 0x162   :  { %1790 = vmatprep.subr.bf16.mxu0 %v1789_v17  ;;  %v1813_v17 = vpack.c.bf16 %v897_v15, %v895_v14  ;;  %v996_v15 = vld [vmem:[#allocation4 + $0x330] sm:$0xff] }
 0x1f5   :  { %v2082_v18 = vpop.f32.mrb[4].mxu1 }
 0x1f6   :  { %v1494_v19 = vpop.f32.mrb[5].mxu1 }
 0x1f7   :  { %v1249_v20 = vpop.f32.mrb[2].mxu0  ;;  %v894_v19 = vld [vmem:[#allocation2 + $0x420] sm:$0xff] }
 0x1f8   :  { %v1250_v22 = vpop.f32.mrb[3].mxu0 }
 0x1f9   :  { %v1251_v24 = vadd.f32 %v1250_v22, %v1249_v20  ;;  %v896_v20 = vld [vmem:[#allocation2 + $0x438] sm:$0xff] }
 0x1fa   :  { %v899_v22 = vld [vmem:[#allocation2 + $0x458] sm:$0xff] }
 0x1fb   :  { %v384_v26 = vadd.f32 %v1251_v24, %v1193_v23  ;;  %v901_v23 = vld [vmem:[#allocation2 + $0x470] sm:$0xff]  ;;  %v1815_v24 = vpack.c.bf16 %v896_v20, %v894_v19  ;;  %v1015_v19 = vld [vmem:[#allocation4 + $0x3c8] sm:$0xff] }
 0x1fd   :  { %v454_v27 = vadd.f32 %v2080_v25, %v384_v26  ;;  %v522_v26 = vrot.slane %v2091_v28, %v113_v53  ;;  %v1026_v28 = vld [vmem:[#allocation4 + $0x420] sm:$0xff] }
 0x1ff   :  { %v457_v38 = vmin.f32 %v454_v27, 0.0  ;;  %v1817_v27 = vpack.c.bf16 %v901_v23, %v899_v22  ;;  %v998_v23 = vld [vmem:[#allocation4 + $0x340] sm:$0xff] }
 0x215   :  { %v2095_v21 = vpop.f32.mrb[6].mxu1 }
 0x216   :  { %v1529_v31 = vpop.f32.mrb[7].mxu1 }
 0x217   :  { %v592_v32 = vpop.f32.mrb[4].mxu0 }
 0x218   :  { %v593_v33 = vadd.f32 %v592_v32, %v514_v29  ;;  %v594_v34 = vpop.f32.mrb[5].mxu0  ;;  %v898_v29 = vld [vmem:[#allocation2 + $0x450] sm:$0xff]  ;;  %v664_v32 = vadd.f32 %v2082_v18, %v522_v26  ;;  %v1027_v18 = vld [vmem:[#allocation4 + $0x428] sm:$0xff] }
 0x219   :  { %v595_v25 = vadd.f32 %v594_v34, %v518_v30  ;;  %v900_v30 = vld [vmem:[#allocation2 + $0x468] sm:$0xff]  ;;  %v1860_v37 = vpack.c.bf16 %v1027_v18, %v1026_v28  ;;  %v1016_v26 = vld [vmem:[#allocation4 + $0x3d0] sm:$0xff]  ;;  %v1021_v18 = vld [vmem:[#allocation4 + $0x3f8] sm:$0xff] }
 0x21a   :  { %v667_v39 = vmax.f32 %v593_v33, 0.0  ;;  %v1819_v31 = vpack.c.bf16 %v900_v30, %v898_v29  ;;  %v1022_v33 = vld [vmem:[#allocation4 + $0x400] sm:$0xff]  ;;  %v1023_v34 = vld [vmem:[#allocation4 + $0x408] sm:$0xff]  ;;  %v868_v36 = vmin.f32 %v664_v32, 0.0  ;;  %v1001_v32 = vld [vmem:[#allocation4 + $0x358] sm:$0xff] }
 0x21b   :  { %v668_v40 = vmul.f32 %v595_v25, %v2061_v63  ;;  %v1854_v35 = vpack.c.bf16 %v1023_v34, %v1022_v33  ;;  %v1024_v25 = vld [vmem:[#allocation4 + $0x410] sm:$0xff]  ;;  %v1018_v33 = vld [vmem:[#allocation4 + $0x3e0] sm:$0xff]  ;;  %v1019_v34 = vld [vmem:[#allocation4 + $0x3e8] sm:$0xff] }
 0x21c   :  { %v669_v42 = vmul.f32 %v667_v39, %v457_v38  ;;  %v1857_v53 = vpack.c.bf16 %v1025_v51, %v1024_v25  ;;  %v1029_v38 = vld [vmem:[#allocation4 + $0x438] sm:$0xff]  ;;  %v1002_v25 = vld [vmem:[#allocation4 + $0x360] sm:$0xff]  ;;  %v1003_v51 = vld [vmem:[#allocation4 + $0x368] sm:$0xff] }
 0x21d   :  { %791 = vmatprep.mubr.f32.mxu0 %v668_v40  ;;  %v1863_v39 = vpack.c.bf16 %v1029_v38, %v1028_v13  ;;  %v1030_v40 = vld [vmem:[#allocation4 + $0x440] sm:$0xff]  ;;  %v1020_v28 = vld [vmem:[#allocation4 + $0x3f0] sm:$0xff]  ;;  %v1005_v38 = vld [vmem:[#allocation4 + $0x378] sm:$0xff] }
 0x21e   :  { %792 = vmatmul.mubr.f32.vlgmr.msra.gmra.mrb[6].mxu0 %v669_v42  ;;  %v1004_v13 = vld [vmem:[#allocation4 + $0x370] sm:$0xff] }
 0x21f   :  { %1792 = vmatpush1.bf16.msra.mxu0 %v1791_v41  ;;  %979 = vmatprep.mubr.f32.mxu0 %v1941_v1  ;;  %v1031_v41 = vld [vmem:[#allocation4 + $0x448] sm:$0xff] }
 0x220   :  { %1794 = vmatprep.subr.bf16.mxu0 %v1793_v43  ;;  %v1866_v42 = vpack.c.bf16 %v1031_v41, %v1030_v40  ;;  %v1033_v43 = vld [vmem:[#allocation4 + $0x458] sm:$0xff]  ;;  %v1196_v41 = vld [vmem:[%s2136_s5 + $0x1] ss:$0 sm:$0xff] }
 0x223   :  { %1796 = vmatpush1.bf16.msra.mxu0 %v1795_v48  ;;  %v1036_v48 = vld [vmem:[#allocation4 + $0x470] sm:$0xff] }
 0x224   :  { %1798 = vmatprep.subr.bf16.mxu0 %v1797_v49  ;;  %v1037_v49 = vld [vmem:[#allocation4 + $0x478] sm:$0xff] }
 0x225   :  { %v1875_v50 = vpack.c.bf16 %v1037_v49, %v1036_v48 }
 0x227   :  { %1800 = vmatpush1.bf16.msra.mxu0 %v1799_v58  ;;  %v990_v58 = vld [vmem:[#allocation4 + $0x300] sm:$0xff] }
 0x228   :  { %1802 = vmatprep.subr.bf16.mxu0 %v1801_v59  ;;  %v991_v59 = vld [vmem:[#allocation4 + $0x308] sm:$0xff] }
 0x229   :  { %v1823_v60 = vpack.c.bf16 %v991_v59, %v990_v58 }
 0x22b   :  { %1804 = vmatpush1.bf16.msra.mxu0 %v1803_v3  ;;  %v1825_v3 = vpack.c.bf16 %v1009_v62, %v1008_v61  ;;  %1824 = vmatpush3.bf16.msra.mxu1 %v1823_v60 }
 0x22c   :  { %1806 = vmatprep.subr.bf16.mxu0 %v1805_v4  ;;  %v993_v4 = vld [vmem:[#allocation4 + $0x318] sm:$0xff] }
 0x22d   :  { %v1827_v7 = vpack.c.bf16 %v993_v4, %v992_v2  ;;  %1826 = vmatprep.subr.bf16.mxu1 %v1825_v3 }
 0x22f   :  { %1808 = vmatpush1.bf16.msra.mxu0 %v1807_v9  ;;  %v995_v9 = vld [vmem:[#allocation4 + $0x328] sm:$0xff]  ;;  %1828 = vmatpush3.bf16.msra.mxu1 %v1827_v7 }
 0x230   :  { %1810 = vmatprep.subr.bf16.mxu0 %v1809_v10  ;;  %v1012_v10 = vld [vmem:[#allocation4 + $0x3b0] sm:$0xff]  ;;  %v1831_v12 = vpack.c.bf16 %v995_v9, %v994_v8 }
 0x231   :  { %v1833_v14 = vpack.c.bf16 %v1013_v11, %v1012_v10 }
 0x233   :  { %1812 = vmatpush1.bf16.msra.mxu0 %v1811_v16  ;;  %v997_v16 = vld [vmem:[#allocation4 + $0x338] sm:$0xff] }
 0x234   :  { %1814 = vmatprep.subr.bf16.mxu0 %v1813_v17  ;;  %v1014_v17 = vld [vmem:[#allocation4 + $0x3c0] sm:$0xff]  ;;  %v1835_v20 = vpack.c.bf16 %v997_v16, %v996_v15 }
 0x235   :  { %v1837_v22 = vpack.c.bf16 %v1015_v19, %v1014_v17 }
 0x237   :  { %1816 = vmatpush1.bf16.msra.mxu0 %v1815_v24  ;;  %v999_v24 = vld [vmem:[#allocation4 + $0x348] sm:$0xff] }
 0x238   :  { %1818 = vmatprep.subr.bf16.mxu0 %v1817_v27  ;;  %v1017_v27 = vld [vmem:[#allocation4 + $0x3d8] sm:$0xff]  ;;  %v1839_v29 = vpack.c.bf16 %v999_v24, %v998_v23 }
 0x239   :  { %v1841_v30 = vpack.c.bf16 %v1017_v27, %v1016_v26 }
 0x23b   :  { %1820 = vmatpush1.bf16.msra.mxu0 %v1819_v31  ;;  %v1000_v31 = vld [vmem:[#allocation4 + $0x350] sm:$0xff] }
 0x23c   :  { %1853 = vmatprep.subr.bf16.mxu0 %v1940_v0 }
 0x23e   :  { %980 = vmatmul.mubr.f32.vlgmr.msra.gmra.mrb[8].mxu0 %v868_v36 }
 0x23f   :  { %1855 = vmatpush3.bf16.msra.mxu0 %v1854_v35  ;;  %1562 = vmatprep.mubr.msk.f32.mxu0 %vm1942_vm0, %v1941_v1  ;;  %v1032_v1 = vld [vmem:[#allocation4 + $0x450] sm:$0xff]  ;;  %v1843_v35 = vpack.c.bf16 %v1001_v32, %v1000_v31 }
 0x240   :  { %1856 = vmatprep.subr.bf16.mxu0 %v1940_v0  ;;  %v1869_v44 = vpack.c.bf16 %v1033_v43, %v1032_v1 }
 0x243   :  { %1858 = vmatpush3.bf16.msra.mxu0 %v1857_v53  ;;  %v1847_v53 = vpack.c.bf16 %v1003_v51, %v1002_v25 }
 0x244   :  { %1859 = vmatprep.subr.bf16.mxu0 %v1940_v0 }
 0x247   :  { %1861 = vmatpush3.bf16.msra.mxu0 %v1860_v37  ;;  %v1849_v37 = vpack.c.bf16 %v1021_v18, %v1020_v28 }
 0x248   :  { %1862 = vmatprep.subr.bf16.mxu0 %v1940_v0 }
 0x24b   :  { %1864 = vmatpush3.bf16.msra.mxu0 %v1863_v39  ;;  %v1851_v39 = vpack.c.bf16 %v1005_v38, %v1004_v13 }
 0x24c   :  { %1865 = vmatprep.subr.bf16.mxu0 %v1940_v0 }
 0x24f   :  { %1867 = vmatpush3.bf16.msra.mxu0 %v1866_v42 }
 0x250   :  { %1868 = vmatprep.subr.bf16.mxu0 %v1940_v0 }
 0x253   :  { %1870 = vmatpush3.bf16.msra.mxu0 %v1869_v44 }
 0x254   :  { %1871 = vmatprep.subr.bf16.mxu0 %v1940_v0 }
 0x257   :  { %1873 = vmatpush3.bf16.msra.mxu0 %v1872_v47  ;;  %v912_v47 = vrot.slane %v1197_v45, %v2052_v55 }
 0x258   :  { %1874 = vmatprep.subr.bf16.mxu0 %v1940_v0  ;;  %v1829_v0 = vpack.c.bf16 %v1011_v6, %v1010_v5 }
 0x25a   :  { %1830 = vmatprep.subr.bf16.mxu1 %v1829_v0 }
 0x25b   :  { %1876 = vmatpush3.bf16.msra.mxu0 %v1875_v50  ;;  %1832 = vmatpush3.bf16.msra.mxu1 %v1831_v12 }
 0x25c   :  { %1834 = vmatprep.subr.bf16.mxu1 %v1833_v14 }
 0x25e   :  { %1563 = vmatmul.mubr.f32.vlgmr.msra.gmra.mrb[10].mxu0 %v868_v36  ;;  %v1845_v36 = vpack.c.bf16 %v1019_v34, %v1018_v33 }
 0x25f   :  { %1836 = vmatpush3.bf16.msra.mxu1 %v1835_v20 }
 0x260   :  { %1838 = vmatprep.subr.bf16.mxu1 %v1837_v22 }
 0x263   :  { %1840 = vmatpush3.bf16.msra.mxu1 %v1839_v29 }
 0x264   :  { %1842 = vmatprep.subr.bf16.mxu1 %v1841_v30 }
 0x267   :  { %1844 = vmatpush3.bf16.msra.mxu1 %v1843_v35 }
 0x268   :  { %1846 = vmatprep.subr.bf16.mxu1 %v1845_v36 }
 0x26b   :  { %1848 = vmatpush3.bf16.msra.mxu1 %v1847_v53 }
 0x26c   :  { %1850 = vmatprep.subr.bf16.mxu1 %v1849_v37 }
 0x26f   :  { %1852 = vmatpush3.bf16.msra.mxu1 %v1851_v39 }
 0x2f1   :  { %v1318_v40 = vpop.f32.mrb[6].mxu0 }
 0x2f2   :  { %v1319_v42 = vpop.f32.mrb[7].mxu0 }
 0x2f3   :  { %v1320_v1 = vadd.f32 %v1319_v42, %v1318_v40 }
 0x2f5   :  { %v794_v43 = vadd.f32 %v1320_v1, %v1196_v41 }
 0x2f7   :  { %v864_v44 = vadd.f32 %v2095_v21, %v794_v43 }
 0x2f9   :  { %v867_v56 = vmin.f32 %v864_v44, 0.0 }
 0x311   :  { %v981_v48 = vpop.f32.mrb[8].mxu0 }
 0x312   :  { %v982_v49 = vadd.f32 %v981_v48, %v908_v46  ;;  %v983_v50 = vpop.f32.mrb[9].mxu0 }
 0x313   :  { %v984_v54 = vadd.f32 %v983_v50, %v912_v47 }
 0x314   :  { %v986_v57 = vmax.f32 %v982_v49, 0.0 }
 0x315   :  { %v987_v58 = vmul.f32 %v984_v54, %v2061_v63 }
 0x316   :  { %v988_v59 = vmul.f32 %v986_v57, %v867_v56 }
 0x317   :  { %1110 = vmatprep.mubr.f32.mxu1 %v987_v58 }
 0x318   :  { %1111 = vmatmul.mubr.f32.vlgmr.msra.gmra.mrb[8].mxu1 %v988_v59 }
 0x331   :  { %v1182_v21 = vpop.f32.mrb[10].mxu0 }
 0x332   :  { %v1564_v60 = vpop.f32.mrb[11].mxu0 }
 0x3eb   :  { %v1370_v61 = vpop.f32.mrb[8].mxu1 }
 0x3ec   :  { %v1371_v62 = vpop.f32.mrb[9].mxu1 }
 0x3ed   :  { %v1372_v55 = vadd.f32 %v1371_v62, %v1370_v61 }
 0x3ef   :  { %v1113_v2 = vadd.f32 %v1372_v55, %v1199_v52 }
 0x3f1   :  { %v1183_v3 = vadd.f32 %v1182_v21, %v1113_v2 }
 0x3f3   :  { %1186 = vst [vmem:[%s2137_s6] sm:$0xff] %v1183_v3 }
 0x3f4   :  { %1191 = vsyncpa [#allocation3], 1 }
 0x3f5   :  { %1192 = vsyncpa [#allocation5], 1 }

</bundles_post_ra>
